<compile_context>
chip_gen: v5e
topology: v5e:2x2
jax: 0.10.0
libtpu: 0.0.40
codegen_flags: <defaults>
</compile_context>

<pallas_src>
import functools

import jax
import jax.numpy as jnp
from jax.experimental import pallas as pl
from jax.experimental.pallas import tpu as pltpu


# ---------------------------------------------------------------------------
# Fused kernel: pool + FC1 + ReLU + FC2 + sigmoid + rescale for one batch tile.
# ---------------------------------------------------------------------------
def _se_fused_kernel(x_ref, w1t_ref, w2t_ref, o_ref, *, spatial_axis):
    # x_ref : (bt, C, HW)  if spatial_axis == 2  (channels-first)
    #         (bt, HW, C)  if spatial_axis == 1  (channels-last, lane-dense C)
    # w1t_ref: (C, C//r)   -- pre-transposed, already scaled by 1/HW
    # w2t_ref: (C//r, C)   -- pre-transposed

    # Squeeze: accumulate in f32 (1/HW folded into w1t).
    pooled = jnp.sum(x_ref[...].astype(jnp.float32), axis=spatial_axis)    # (bt, C)

    # Excitation: batched FC -> ReLU -> FC -> sigmoid, f32 accumulation on MXU.
    h = jnp.dot(pooled.astype(w1t_ref.dtype), w1t_ref[...],
                preferred_element_type=jnp.float32)                        # (bt, C//r)
    h = jnp.maximum(h, 0.0)
    s = jnp.dot(h.astype(w2t_ref.dtype), w2t_ref[...],
                preferred_element_type=jnp.float32)                        # (bt, C)
    s = jax.nn.sigmoid(s)

    # Scale: re-read x from VMEM (cheap), multiply in f32, cast once on store.
    if spatial_axis == 1:          # (bt, HW, C): broadcast gate along sublanes
        gate = s[:, None, :]
    else:                          # (bt, C, HW): broadcast gate along lanes
        gate = s[:, :, None]
    o_ref[...] = (x_ref[...].astype(jnp.float32) * gate).astype(o_ref.dtype)


# ---------------------------------------------------------------------------
# Oversized-image fallback kernels (channel-tiled, native NCHW, no transposes).
# ---------------------------------------------------------------------------
def _pool_nchw_kernel(x_ref, o_ref):
    # x_ref: (1, ct, H, W) -> o_ref: (1, ct, 1, 1) f32 per-channel sums.
    o_ref[...] = jnp.sum(x_ref[...].astype(jnp.float32), axis=(2, 3), keepdims=True)


def _scale_nchw_kernel(x_ref, g_ref, o_ref):
    # x_ref: (1, ct, H, W), g_ref: (1, ct, 1, 1) f32 gate.
    o_ref[...] = (x_ref[...].astype(jnp.float32) * g_ref[...]).astype(o_ref.dtype)


# ---------------------------------------------------------------------------
# Sizing helpers.
# ---------------------------------------------------------------------------
def _chip_hints():
    """(vmem_capacity_bytes, is_multi_tensorcore) with conservative fallbacks."""
    vmem_capacity = 64 << 20      # smallest per-TC VMEM across generations (v7x)
    try:
        vmem_capacity = int(pltpu.get_tpu_info().vmem_capacity_bytes)
    except Exception:
        pass
    multi_core = False
    try:
        kind = jax.devices()[0].device_kind.lower()
        multi_core = any(tag in kind for tag in ("v4", "v5p", "v7"))
    except Exception:
        pass
    return vmem_capacity, multi_core


def _lane_utilization(d):
    return d / float(((d + 127) // 128) * 128)


def _pick_b_tile(b, per_image_bytes, target_bytes, prefer_multi_core_split):
    """Largest batch tile whose block fits; on multi-TC parts prefer an even grid."""
    fits = [t for t in range(1, b + 1)
            if b % t == 0 and t * per_image_bytes <= target_bytes]
    if not fits:
        return None
    if prefer_multi_core_split:
        even = [t for t in fits if (b // t) % 2 == 0]
        if even:
            return max(even)
        multi = [t for t in fits if (b // t) >= 2]
        if multi:
            return max(multi)
    return max(fits)


def _largest_divisor_at_most(n, cap):
    cap = max(1, min(n, cap))
    for d in range(cap, 0, -1):
        if n % d == 0:
            return d
    return 1


# ---------------------------------------------------------------------------
# pallas_call wrappers.
# ---------------------------------------------------------------------------
def _se_fused_call(x3, w1t, w2t, bt, spatial_axis, vmem_limit, cost,
                   weight_pipeline_mode):
    b, d1, d2 = x3.shape

    def _weight_spec(shape):
        if weight_pipeline_mode is None:
            return pl.BlockSpec(shape, lambda i: (0, 0))
        return pl.BlockSpec(shape, lambda i: (0, 0),
                            pipeline_mode=weight_pipeline_mode)

    return pl.pallas_call(
        functools.partial(_se_fused_kernel, spatial_axis=spatial_axis),
        out_shape=jax.ShapeDtypeStruct((b, d1, d2), x3.dtype),
        grid_spec=pltpu.PrefetchScalarGridSpec(
            num_scalar_prefetch=0,
            grid=(b // bt,),
            in_specs=[
                pl.BlockSpec((bt, d1, d2), lambda i: (i, 0, 0)),
                _weight_spec(w1t.shape),
                _weight_spec(w2t.shape),
            ],
            out_specs=pl.BlockSpec((bt, d1, d2), lambda i: (i, 0, 0)),
        ),
        compiler_params=pltpu.CompilerParams(
            dimension_semantics=("parallel",),
            vmem_limit_bytes=vmem_limit,
        ),
        cost_estimate=cost,
    )(x3, w1t, w2t)


def _se_split_call(x, w1, w2, target_block_bytes, vmem_capacity):
    """Fallback when one image exceeds the block budget: channel-tiled two-pass."""
    b, c, h, w = x.shape
    hw = h * w
    itemsize = x.dtype.itemsize
    # Largest channel tile whose (1, ct, H, W) block fits the target.
    # TODO(synk): a single (H, W) plane larger than the block budget would also
    # need spatial tiling; not needed for realistic SE feature-map sizes.
    ct = _largest_divisor_at_most(c, max(1, target_block_bytes // max(1, hw * itemsize)))
    block_bytes = ct * hw * itemsize
    vmem_limit = int(min(max(8 * block_bytes + (4 << 20), 16 << 20),
                         (vmem_capacity * 3) // 4))
    grid = (b, c // ct)
    semantics = ("parallel", "parallel")

    pooled = pl.pallas_call(
        _pool_nchw_kernel,
        out_shape=jax.ShapeDtypeStruct((b, c, 1, 1), jnp.float32),
        grid_spec=pltpu.PrefetchScalarGridSpec(
            num_scalar_prefetch=0,
            grid=grid,
            in_specs=[pl.BlockSpec((1, ct, h, w), lambda i, j: (i, j, 0, 0))],
            out_specs=pl.BlockSpec((1, ct, 1, 1), lambda i, j: (i, j, 0, 0)),
        ),
        compiler_params=pltpu.CompilerParams(
            dimension_semantics=semantics, vmem_limit_bytes=vmem_limit),
        cost_estimate=pl.CostEstimate(
            flops=b * c * hw, transcendentals=0,
            bytes_accessed=b * c * hw * itemsize + b * c * 4),
    )(x)

    # Excitation on the tiny (B, C) pooled tensor: plain XLA, negligible cost.
    y = pooled.reshape(b, c) * (1.0 / float(hw))
    y = jnp.maximum(y @ w1.astype(jnp.float32).T, 0.0)
    gate = jax.nn.sigmoid(y @ w2.astype(jnp.float32).T).reshape(b, c, 1, 1)
    gate = gate.astype(jnp.float32)

    return pl.pallas_call(
        _scale_nchw_kernel,
        out_shape=jax.ShapeDtypeStruct(x.shape, x.dtype),
        grid_spec=pltpu.PrefetchScalarGridSpec(
            num_scalar_prefetch=0,
            grid=grid,
            in_specs=[
                pl.BlockSpec((1, ct, h, w), lambda i, j: (i, j, 0, 0)),
                pl.BlockSpec((1, ct, 1, 1), lambda i, j: (i, j, 0, 0)),
            ],
            out_specs=pl.BlockSpec((1, ct, h, w), lambda i, j: (i, j, 0, 0)),
        ),
        compiler_params=pltpu.CompilerParams(
            dimension_semantics=semantics, vmem_limit_bytes=vmem_limit),
        cost_estimate=pl.CostEstimate(
            flops=b * c * hw, transcendentals=0,
            bytes_accessed=2 * b * c * hw * itemsize),
    )(x, gate)


# ---------------------------------------------------------------------------
# Public entry point (matches SELayer.forward semantics).
# ---------------------------------------------------------------------------
def se_layer(x, w1, w2, *, target_block_bytes=None):
    """SELayer forward.

    x : (B, C, H, W)
    w1: (C//r, C)  -- nn.Linear(C, C//r, bias=False).weight
    w2: (C, C//r)  -- nn.Linear(C//r, C, bias=False).weight
    """
    b, c, h, w = x.shape
    hw = h * w
    cr = w1.shape[0]
    itemsize = x.dtype.itemsize

    vmem_capacity, multi_core = _chip_hints()
    if target_block_bytes is None:
        # ~8 MiB blocks keep per-step overhead small behind v7x's 3.2 TB/s HBM
        # while 4*block + weights stays well under 3/4 of its 64 MiB VMEM;
        # v5e/v6e are already on the bandwidth plateau at this size.
        target_block_bytes = int(min(8 << 20, max(2 << 20, vmem_capacity // 8)))

    per_image_bytes = c * hw * itemsize
    if per_image_bytes > target_block_bytes:
        # One image does not fit the block budget -> channel-tiled two-kernel path.
        return _se_split_call(x, w1, w2, target_block_bytes, vmem_capacity)

    # ---- fused single-kernel path ------------------------------------------
    # Lane-dense layout: put whichever of C / HW packs the 128-lane axis better
    # on lanes.  HW % 128 == 0 keeps the native (B, C, HW) view (no transposes).
    channels_last = (hw % 128 != 0) and (_lane_utilization(c) > _lane_utilization(hw))
    if channels_last:
        x3 = jnp.transpose(x, (0, 2, 3, 1)).reshape(b, hw, c)    # (B, HW, C)
        spatial_axis = 1
    else:
        x3 = x.reshape(b, c, hw)                                  # (B, C, HW)
        spatial_axis = 2

    # One-time host-side weight prep: transpose, fold 1/HW of the average pool
    # into the first FC (bias-free => exact algebra); bf16 weights for bf16
    # activations (MXU-native, halves weight VMEM/DMA), f32 otherwise.
    mxu_dtype = jnp.bfloat16 if x.dtype == jnp.bfloat16 else jnp.float32
    w1t = (w1.T.astype(jnp.float32) * (1.0 / float(hw))).astype(mxu_dtype)  # (C, C//r)
    w2t = w2.T.astype(mxu_dtype)                                             # (C//r, C)

    bt = _pick_b_tile(b, per_image_bytes, target_block_bytes, multi_core)
    block_bytes = bt * per_image_bytes
    weight_bytes = (w1t.size + w2t.size) * w1t.dtype.itemsize
    # in + out double-buffered x blocks, single-buffered weights, plus slack;
    # capped with headroom below this generation's physical per-core VMEM.
    vmem_limit = int(min(max(4 * block_bytes + weight_bytes + (4 << 20), 16 << 20),
                         (vmem_capacity * 3) // 4))

    cost = pl.CostEstimate(
        flops=2 * b * c * hw + 4 * b * c * cr,
        transcendentals=b * c,
        bytes_accessed=2 * b * c * hw * itemsize + 2 * weight_bytes,
    )

    try:
        out3 = _se_fused_call(x3, w1t, w2t, bt, spatial_axis, vmem_limit, cost,
                              weight_pipeline_mode=pl.Buffered(1))
    except Exception:
        # TODO(synk): pl.Buffered(1) (single-buffered constant weights) rejected on
        # this jax/Mosaic version; retry with default double-buffered weights.
        out3 = _se_fused_call(x3, w1t, w2t, bt, spatial_axis, vmem_limit, cost,
                              weight_pipeline_mode=None)

    if channels_last:
        return jnp.transpose(out3.reshape(b, h, w, c), (0, 3, 1, 2))
    return out3.reshape(b, c, h, w)


# ---------------------------------------------------------------------------
# Pure-JAX reference (mirrors the PyTorch SELayer forward).
# ---------------------------------------------------------------------------
def se_layer_ref(x, w1, w2):
    y = jnp.mean(x.astype(jnp.float32), axis=(2, 3))                 # (B, C)
    y = jnp.maximum(y @ w1.astype(jnp.float32).T, 0.0)               # (B, C//r)
    y = jax.nn.sigmoid(y @ w2.astype(jnp.float32).T)                 # (B, C)
    return (x.astype(jnp.float32) * y[:, :, None, None]).astype(x.dtype)


if __name__ == "__main__":
    key = jax.random.PRNGKey(0)
    kx1, kx2, kw1, kw2, kw3, kw4 = jax.random.split(key, 6)

    def check(x, w1, w2, **kw):
        out = jax.block_until_ready(se_layer(x, w1, w2, **kw))
        ref = se_layer_ref(x, w1, w2)
        assert out.shape == x.shape and out.dtype == x.dtype
        assert jnp.allclose(out, ref, atol=1e-5, rtol=1e-5)

    # Case 1: production-style SE shape (HW = 49, not a multiple of 128; C = 128):
    # exercises the lane-dense channels-last fused path.
    B, C, H, W, r = 2, 128, 7, 7, 16
    x = jax.random.normal(kx1, (B, C, H, W), dtype=jnp.float32)
    w1 = jax.random.normal(kw1, (C // r, C), dtype=jnp.float32) * 0.1   # Linear(C, C//r)
    w2 = jax.random.normal(kw2, (C, C // r), dtype=jnp.float32) * 0.1   # Linear(C//r, C)
    check(x, w1, w2)

    # Case 2: HW a multiple of 128 -> channels-first fused path (no transpose).
    B2, C2, H2, W2, r2 = 2, 32, 16, 16, 16
    x2 = jax.random.normal(kx2, (B2, C2, H2, W2), dtype=jnp.float32)
    w1b = jax.random.normal(kw3, (C2 // r2, C2), dtype=jnp.float32) * 0.1
    w2b = jax.random.normal(kw4, (C2, C2 // r2), dtype=jnp.float32) * 0.1
    check(x2, w1b, w2b)

    # Case 3: force the oversized-image fallback (channel-tiled pool/scale kernels).
    check(x2, w1b, w2b, target_block_bytes=2048)

    print("KERNEL_OK")
</pallas_src>

<mosaic_0001>
module attributes {stable_mosaic.version = 11 : i64} {
  func.func @_se_fused_kernel(%arg0: i32, %arg1: memref<2x49x128xf32, #tpu.memory_space<vmem>>, %arg2: memref<128x8xf32, #tpu.memory_space<vmem>>, %arg3: memref<8x128xf32, #tpu.memory_space<vmem>>, %arg4: memref<2x49x128xf32, #tpu.memory_space<vmem>>) attributes {dimension_semantics = [#tpu.dimension_semantics<parallel>], iteration_bounds = array<i64: 1>, scalar_prefetch = 0 : i64, scratch_operands = 0 : i64, tpu.core_type = #tpu.core_type<tc>, window_params = [{transform_indices = @transform_0, window_bounds = array<i64: 2, 49, 128>}, {pipeline_mode = #tpu.pipeline_mode<synchronous>, transform_indices = @transform_1, window_bounds = array<i64: 128, 8>}, {pipeline_mode = #tpu.pipeline_mode<synchronous>, transform_indices = @transform_2, window_bounds = array<i64: 8, 128>}, {transform_indices = @transform_3, window_bounds = array<i64: 2, 49, 128>}]} {
    %c0 = arith.constant 0 : index
    %c0_0 = arith.constant 0 : index
    %c0_1 = arith.constant 0 : index
    %0 = vector.load %arg1[%c0, %c0_0, %c0_1] : memref<2x49x128xf32, #tpu.memory_space<vmem>>, vector<2x49x128xf32>
    %cst = arith.constant dense<0.000000e+00> : vector<2x128xf32>
    %1 = vector.multi_reduction <add>, %0, %cst [1] : vector<2x49x128xf32> to vector<2x128xf32>
    %c0_2 = arith.constant 0 : index
    %c0_3 = arith.constant 0 : index
    %2 = vector.load %arg2[%c0_2, %c0_3] : memref<128x8xf32, #tpu.memory_space<vmem>>, vector<128x8xf32>
    %cst_4 = arith.constant dense<0.000000e+00> : vector<2x8xf32>
    %3 = tpu.matmul %1, %2, %cst_4 {dimension_numbers = #tpu.dot_dimension_numbers<[1], [0], [0], [1], [0, 0, 1, 1], [], []>} : vector<2x128xf32>, vector<128x8xf32>, vector<2x8xf32> -> vector<2x8xf32>
    %cst_5 = arith.constant 0.000000e+00 : f32
    %4 = vector.broadcast %cst_5 : f32 to vector<2x8xf32>
    %5 = arith.maximumf %3, %4 : vector<2x8xf32>
    %c0_6 = arith.constant 0 : index
    %c0_7 = arith.constant 0 : index
    %6 = vector.load %arg3[%c0_6, %c0_7] : memref<8x128xf32, #tpu.memory_space<vmem>>, vector<8x128xf32>
    %cst_8 = arith.constant dense<0.000000e+00> : vector<2x128xf32>
    %7 = tpu.matmul %5, %6, %cst_8 {dimension_numbers = #tpu.dot_dimension_numbers<[1], [0], [0], [1], [0, 0, 1, 1], [], []>} : vector<2x8xf32>, vector<8x128xf32>, vector<2x128xf32> -> vector<2x128xf32>
    %8 = arith.negf %7 : vector<2x128xf32>
    %9 = math.exp %8 : vector<2x128xf32>
    %cst_9 = arith.constant 1.000000e+00 : f32
    %10 = vector.broadcast %cst_9 : f32 to vector<2x128xf32>
    %11 = arith.addf %10, %9 : vector<2x128xf32>
    %12 = arith.divf %10, %11 : vector<2x128xf32>
    %13 = vector.shape_cast %12 : vector<2x128xf32> to vector<2x1x128xf32>
    %c0_10 = arith.constant 0 : index
    %c0_11 = arith.constant 0 : index
    %c0_12 = arith.constant 0 : index
    %14 = vector.load %arg1[%c0_10, %c0_11, %c0_12] : memref<2x49x128xf32, #tpu.memory_space<vmem>>, vector<2x49x128xf32>
    %15 = vector.broadcast %13 : vector<2x1x128xf32> to vector<2x49x128xf32>
    %16 = arith.mulf %14, %15 : vector<2x49x128xf32>
    %c0_13 = arith.constant 0 : index
    %c0_14 = arith.constant 0 : index
    %c0_15 = arith.constant 0 : index
    %17 = vector.load %arg4[%c0_13, %c0_14, %c0_15] : memref<2x49x128xf32, #tpu.memory_space<vmem>>, vector<2x49x128xf32>
    tpu.vector_store %arg4[%c0_13, %c0_14, %c0_15], %16 {strides = array<i32>} : memref<2x49x128xf32, #tpu.memory_space<vmem>>, vector<2x49x128xf32>,
    return
  }
  func.func @transform_0(%arg0: i32) -> (i32, i32, i32) {
    %c0_i32 = arith.constant 0 : i32
    %c0_i32_0 = arith.constant 0 : i32
    %c0_i32_1 = arith.constant 0 : i32
    return %arg0, %c0_i32, %c0_i32_0 : i32, i32, i32
  }
  func.func @transform_1(%arg0: i32) -> (i32, i32) {
    %c0_i32 = arith.constant 0 : i32
    %c0_i32_0 = arith.constant 0 : i32
    %c0_i32_1 = arith.constant 0 : i32
    return %c0_i32, %c0_i32_0 : i32, i32
  }
  func.func @transform_2(%arg0: i32) -> (i32, i32) {
    %c0_i32 = arith.constant 0 : i32
    %c0_i32_0 = arith.constant 0 : i32
    %c0_i32_1 = arith.constant 0 : i32
    return %c0_i32, %c0_i32_0 : i32, i32
  }
  func.func @transform_3(%arg0: i32) -> (i32, i32, i32) {
    %c0_i32 = arith.constant 0 : i32
    %c0_i32_0 = arith.constant 0 : i32
    %c0_i32_1 = arith.constant 0 : i32
    return %arg0, %c0_i32, %c0_i32_0 : i32, i32, i32
  }
}

module attributes {stable_mosaic.version = 11 : i64} {
  func.func @_se_fused_kernel(%arg0: i32, %arg1: memref<2x49x128xf32, #tpu.memory_space<vmem>>, %arg2: memref<128x8xf32, #tpu.memory_space<vmem>>, %arg3: memref<8x128xf32, #tpu.memory_space<vmem>>, %arg4: memref<2x49x128xf32, #tpu.memory_space<vmem>>) attributes {dimension_semantics = [#tpu.dimension_semantics<parallel>], iteration_bounds = array<i64: 1>, scalar_prefetch = 0 : i64, scratch_operands = 0 : i64, tpu.core_type = #tpu.core_type<tc>, window_params = [{transform_indices = @transform_0, window_bounds = array<i64: 2, 49, 128>}, {pipeline_mode = #tpu.pipeline_mode<synchronous>, transform_indices = @transform_1, window_bounds = array<i64: 128, 8>}, {pipeline_mode = #tpu.pipeline_mode<synchronous>, transform_indices = @transform_2, window_bounds = array<i64: 8, 128>}, {transform_indices = @transform_3, window_bounds = array<i64: 2, 49, 128>}]} {
    %c0 = arith.constant 0 : index
    %c0_0 = arith.constant 0 : index
    %c0_1 = arith.constant 0 : index
    %0 = vector.load %arg1[%c0, %c0_0, %c0_1] : memref<2x49x128xf32, #tpu.memory_space<vmem>>, vector<2x49x128xf32>
    %cst = arith.constant dense<0.000000e+00> : vector<2x128xf32>
    %1 = vector.multi_reduction <add>, %0, %cst [1] : vector<2x49x128xf32> to vector<2x128xf32>
    %c0_2 = arith.constant 0 : index
    %c0_3 = arith.constant 0 : index
    %2 = vector.load %arg2[%c0_2, %c0_3] : memref<128x8xf32, #tpu.memory_space<vmem>>, vector<128x8xf32>
    %cst_4 = arith.constant dense<0.000000e+00> : vector<2x8xf32>
    %3 = tpu.matmul %1, %2, %cst_4 {dimension_numbers = #tpu.dot_dimension_numbers<[1], [0], [0], [1], [0, 0, 1, 1], [], []>} : vector<2x128xf32>, vector<128x8xf32>, vector<2x8xf32> -> vector<2x8xf32>
    %cst_5 = arith.constant 0.000000e+00 : f32
    %4 = vector.broadcast %cst_5 : f32 to vector<2x8xf32>
    %5 = arith.maximumf %3, %4 : vector<2x8xf32>
    %c0_6 = arith.constant 0 : index
    %c0_7 = arith.constant 0 : index
    %6 = vector.load %arg3[%c0_6, %c0_7] : memref<8x128xf32, #tpu.memory_space<vmem>>, vector<8x128xf32>
    %cst_8 = arith.constant dense<0.000000e+00> : vector<2x128xf32>
    %7 = tpu.matmul %5, %6, %cst_8 {dimension_numbers = #tpu.dot_dimension_numbers<[1], [0], [0], [1], [0, 0, 1, 1], [], []>} : vector<2x8xf32>, vector<8x128xf32>, vector<2x128xf32> -> vector<2x128xf32>
    %8 = arith.negf %7 : vector<2x128xf32>
    %9 = math.exp %8 : vector<2x128xf32>
    %cst_9 = arith.constant 1.000000e+00 : f32
    %10 = vector.broadcast %cst_9 : f32 to vector<2x128xf32>
    %11 = arith.addf %10, %9 : vector<2x128xf32>
    %12 = arith.divf %10, %11 : vector<2x128xf32>
    %13 = vector.shape_cast %12 : vector<2x128xf32> to vector<2x1x128xf32>
    %c0_10 = arith.constant 0 : index
    %c0_11 = arith.constant 0 : index
    %c0_12 = arith.constant 0 : index
    %14 = vector.load %arg1[%c0_10, %c0_11, %c0_12] : memref<2x49x128xf32, #tpu.memory_space<vmem>>, vector<2x49x128xf32>
    %15 = vector.broadcast %13 : vector<2x1x128xf32> to vector<2x49x128xf32>
    %16 = arith.mulf %14, %15 : vector<2x49x128xf32>
    %c0_13 = arith.constant 0 : index
    %c0_14 = arith.constant 0 : index
    %c0_15 = arith.constant 0 : index
    %17 = vector.load %arg4[%c0_13, %c0_14, %c0_15] : memref<2x49x128xf32, #tpu.memory_space<vmem>>, vector<2x49x128xf32>
    tpu.vector_store %arg4[%c0_13, %c0_14, %c0_15], %16 {strides = array<i32>} : memref<2x49x128xf32, #tpu.memory_space<vmem>>, vector<2x49x128xf32>,
    return
  }
  func.func @transform_0(%arg0: i32) -> (i32, i32, i32) {
    %c0_i32 = arith.constant 0 : i32
    %c0_i32_0 = arith.constant 0 : i32
    %c0_i32_1 = arith.constant 0 : i32
    return %arg0, %c0_i32, %c0_i32_0 : i32, i32, i32
  }
  func.func @transform_1(%arg0: i32) -> (i32, i32) {
    %c0_i32 = arith.constant 0 : i32
    %c0_i32_0 = arith.constant 0 : i32
    %c0_i32_1 = arith.constant 0 : i32
    return %c0_i32, %c0_i32_0 : i32, i32
  }
  func.func @transform_2(%arg0: i32) -> (i32, i32) {
    %c0_i32 = arith.constant 0 : i32
    %c0_i32_0 = arith.constant 0 : i32
    %c0_i32_1 = arith.constant 0 : i32
    return %c0_i32, %c0_i32_0 : i32, i32
  }
  func.func @transform_3(%arg0: i32) -> (i32, i32, i32) {
    %c0_i32 = arith.constant 0 : i32
    %c0_i32_0 = arith.constant 0 : i32
    %c0_i32_1 = arith.constant 0 : i32
    return %arg0, %c0_i32, %c0_i32_0 : i32, i32, i32
  }
}

</mosaic_0001>

<bundles_post_ra>
// kernel: tpu_custom_call.1
= control target key start
LH: loop header
LB: loop body
LE: loop exit
PB: predicated region body
PF: predicated region fallthrough
CT: control target
= control target key end

     0   :  { %vm33_vm0 = vcmask 1040384   ;;  %vm73_vm1 = vcmask 1041409   ;;  %vm98_vm2 = vcmask 64512   ;;  %s398_s1 = inlined_call_operand.vmem [shape: f32[128,8], index: 1, kind: input, shape index: {}]   ;;  %s399_s0 = inlined_call_operand.vmem [shape: f32[2,49,128], index: 0, kind: input, shape index: {}]   ;;  %s400_s2 = inlined_call_operand.vmem [shape: f32[8,128], index: 2, kind: input, shape index: {}]   ;;  %s401_s3 = inlined_call_operand.vmem [shape: f32[2,49,128], index: 3, kind: output, shape index: {}]  }
   0x1   :  { %v70_v0 = vld [vmem:[%s398_s1 + $0x78] sm:$0xff]  ;;  %v69_v1 = vld [vmem:[%s398_s1 + $0x70] sm:$0xff]  ;;  %v68_v2 = vld [vmem:[%s398_s1 + $0x68] sm:$0xff] }
   0x2   :  { %76 = vmatpush.msra.mxu0 %v70_v0  ;;  %v67_v3 = vld [vmem:[%s398_s1 + $0x60] sm:$0xff]  ;;  %v225_v5 = vld [vmem:[%s399_s0 + $0x8] sm:$0xff]  ;;  %v66_v6 = vld [vmem:[%s398_s1 + $0x58] sm:$0xff] }
   0x3   :  { %v220_v4 = vld [vmem:[%s399_s0] sm:$0xff]  ;;  %v233_v7 = vld [vmem:[%s399_s0 + $0x10] sm:$0xff]  ;;  %v240_v9 = vld [vmem:[%s399_s0 + $0x18] sm:$0xff] }
   0x4   :  { %77 = vmatpush.msra.mxu0 %v69_v1  ;;  %v28_v8 = vadd.f32 %v225_v5, %v220_v4  ;;  %v245_v10 = vld [vmem:[%s399_s0 + $0x38] sm:$0xff]  ;;  %v65_v11 = vld [vmem:[%s398_s1 + $0x50] sm:$0xff]  ;;  %v253_v12 = vld [vmem:[%s399_s0 + $0x40] sm:$0xff] }
   0x5   :  { %v258_v13 = vld [vmem:[%s399_s0 + $0x48] sm:$0xff]  ;;  %v264_v15 = vld [vmem:[%s399_s0 + $0x20] sm:$0xff]  ;;  %v42_v16 = vadd.f32 %v253_v12, %v245_v10  ;;  %v274_v18 = vld [vmem:[%s399_s0 + $0x30] sm:$0x1] }
   0x6   :  { %78 = vmatpush.msra.mxu0 %v68_v2  ;;  %v29_v14 = vadd.f32 %v28_v8, %v233_v7  ;;  %v64_v17 = vld [vmem:[%s398_s1 + $0x48] sm:$0xff]  ;;  %v279_v19 = vld [vmem:[%s399_s0 + $0x50] sm:$0xff]  ;;  %v63_v23 = vld [vmem:[%s398_s1 + $0x40] sm:$0xff]  ;;  %v34_v27 = vsel %vm33_vm0, %v274_v18, 0.0 }
   0x7   :  { %v285_v21 = vld [vmem:[%s399_s0 + $0x28] sm:$0xff]  ;;  %v43_v22 = vadd.f32 %v42_v16, %v258_v13  ;;  %v294_v24 = vld [vmem:[%s399_s0 + $0x58] sm:$0xff]  ;;  %v311_v30 = vld [vmem:[%s399_s0 + $0x60] sm:$0xff] }
   0x8   :  { %79 = vmatpush.msra.mxu0 %v67_v3  ;;  %v30_v20 = vadd.f32 %v29_v14, %v240_v9  ;;  %v300_v26 = vld [vmem:[%s399_s0 + $0x68] sm:$0x1]  ;;  %v62_v29 = vld [vmem:[%s398_s1 + $0x38] sm:$0xff]  ;;  %v61_v33 = vld [vmem:[%s398_s1 + $0x30] sm:$0xff] }
   0x9   :  { %v44_v28 = vadd.f32 %v43_v22, %v279_v19  ;;  %v47_v35 = vsel %vm33_vm0, %v300_v26, 0.0  ;;  %v60_v37 = vld [vmem:[%s398_s1 + $0x28] sm:$0xff]  ;;  %v59_v40 = vld [vmem:[%s398_s1 + $0x20] sm:$0xff]  ;;  %v58_v43 = vld [vmem:[%s398_s1 + $0x18] sm:$0xff] }
   0xa   :  { %80 = vmatpush.msra.mxu0 %v66_v6  ;;  %v31_v25 = vadd.f32 %v30_v20, %v264_v15  ;;  %v57_v46 = vld [vmem:[%s398_s1 + $0x10] sm:$0xff]  ;;  %v56_v49 = vld [vmem:[%s398_s1 + $0x8] sm:$0xff]  ;;  %v55_v52 = vld [vmem:[%s398_s1] sm:$0xff] }
   0xb   :  { %v45_v32 = vadd.f32 %v44_v28, %v294_v24  ;;  %v97_v57 = vld [vmem:[%s400_s2] sm:$0xff] }
   0xc   :  { %81 = vmatpush.msra.mxu0 %v65_v11  ;;  %v32_v31 = vadd.f32 %v31_v25, %v285_v21  ;;  %117 = vmatpush.msra.mxu1 %v97_v57 }
   0xd   :  { %v46_v36 = vadd.f32 %v45_v32, %v311_v30 }
   0xe   :  { %82 = vmatpush.msra.mxu0 %v64_v17  ;;  %v35_v34 = vadd.f32 %v34_v27, %v32_v31 }
   0xf   :  { %v48_v39 = vadd.f32 %v47_v35, %v46_v36 }
  0x10   :  { %83 = vmatpush.msra.mxu0 %v63_v23  ;;  %v36_v38 = vrot.slane %v35_v34, 4 }
  0x11   :  { %v49_v42 = vrot.slane %v48_v39, 4 }
  0x12   :  { %84 = vmatpush.msra.mxu0 %v62_v29  ;;  %v37_v41 = vadd.f32 %v36_v38, %v35_v34 }
  0x13   :  { %v50_v45 = vadd.f32 %v49_v42, %v48_v39 }
  0x14   :  { %85 = vmatpush.msra.mxu0 %v61_v33  ;;  %v38_v44 = vrot.slane %v37_v41, 2 }
  0x15   :  { %v51_v48 = vrot.slane %v50_v45, 2 }
  0x16   :  { %86 = vmatpush.msra.mxu0 %v60_v37  ;;  %v39_v47 = vadd.f32 %v38_v44, %v37_v41 }
  0x17   :  { %v52_v51 = vadd.f32 %v51_v48, %v50_v45 }
  0x18   :  { %87 = vmatpush.msra.mxu0 %v59_v40  ;;  %v40_v50 = vrot.slane %v39_v47, 1 }
  0x19   :  { %v53_v54 = vrot.slane %v52_v51, 1 }
  0x1a   :  { %88 = vmatpush.msra.mxu0 %v58_v43  ;;  %v41_v53 = vadd.f32 %v40_v50, %v39_v47 }
  0x1b   :  { %v54_v55 = vadd.f32 %v53_v54, %v52_v51 }
  0x1c   :  { %89 = vmatpush.msra.mxu0 %v57_v46 }
  0x1d   :  { %v74_v56 = vsel %vm73_vm1, %v54_v55, %v41_v53 }
  0x1e   :  { %90 = vmatpush.msra.mxu0 %v56_v49 }
  0x20   :  { %91 = vmatpush.msra.mxu0 %v55_v52 }
  0x21   :  { %92 = vmatmul.f32.vlgmr.msra.gmra.mxu0 %v74_v56 }
  0x9e   :  { %v93_v58 = vpop.f32.mrf.mxu0 }
  0x9f   :  { %v96_v59 = vmax.f32 %v93_v58, 0.0 }
  0xa1   :  { %179 = vmatmul.msk.f32.vlgmr.msra.gmra.mxu1 %vm98_vm2, %v96_v59 }
 0x11e   :  { %v119_v60 = vpop.f32.mrf.mxu1 }
 0x11f   :  { %v180_v61 = vmul.f32 -1.442695, %v119_v60 }
 0x121   :  { %181 = vpow2.f32 %v180_v61 }
 0x127   :  { %v182_v62 = vpop.eup %181 }
 0x128   :  { %v125_v63 = vadd.f32 1.0, %v182_v62 }
 0x12a   :  { %183 = vrcp.f32 %v125_v63  ;;  %v137_v3 = vand.u32 2147483648, %v125_v63  ;;  %v135_v8 = vand.u32 2147483647, %v125_v63  ;;  %vm131_vm4 = vweird.f32 %v125_v63 }
 0x12c   :  { %v138_v14 = vor.u32 1.1754944e-38, %v137_v3  ;;  %vm136_vm6 = vcmp.eq.f32.partialorder %v135_v8, 8.507059e+37 }
 0x130   :  { %v184_v0 = vpop.eup %183 }
 0x131   :  { %v127_v1 = vmul.f32 %v184_v0, %v125_v63  ;;  %vm132_vm3 = vweird.f32 %v184_v0 }
 0x132   :  { %vm133_vm5 = vmor %vm131_vm4, %vm132_vm3 }
 0x133   :  { %v128_v2 = vsub.f32 1.0, %v127_v1 }
 0x135   :  { %v129_v6 = vmul.f32 %v184_v0, %v128_v2 }
 0x137   :  { %v130_v11 = vadd.f32 %v184_v0, %v129_v6 }
 0x139   :  { %v134_v16 = vsel %vm133_vm5, %v184_v0, %v130_v11 }
 0x13a   :  { %v139_v17 = vsel %vm136_vm6, %v138_v14, %v134_v16 }
 0x13b   :  { %v142_v20 = vrot.slane %v139_v17, 1  ;;  %v143_v22 = vperm.slane %v139_v17, 0 }
 0x13d   :  { %v147_v23 = vmul.f32 %v143_v22, %v220_v4  ;;  %v148_v25 = vmul.f32 %v143_v22, %v225_v5  ;;  %v149_v27 = vmul.f32 %v143_v22, %v233_v7  ;;  %v144_v28 = vperm.slane %v142_v20, 0 }
 0x13e   :  { %v150_v29 = vmul.f32 %v143_v22, %v240_v9  ;;  %v151_v31 = vmul.f32 %v143_v22, %v264_v15  ;;  %v152_v32 = vmul.f32 %v143_v22, %v285_v21  ;;  %v153_v4 = vmul.f32 %v143_v22, %v274_v18 }
 0x13f   :  { %161 = vst [vmem:[%s401_s3] sm:$0xff] %v147_v23  ;;  %v154_v5 = vmul.f32 %v144_v28, %v245_v10  ;;  %v155_v7 = vmul.f32 %v144_v28, %v253_v12  ;;  %v156_v9 = vmul.f32 %v144_v28, %v258_v13  ;;  %v157_v15 = vmul.f32 %v144_v28, %v279_v19 }
 0x140   :  { %162 = vst [vmem:[%s401_s3 + $0x8] sm:$0xff] %v148_v25  ;;  %v158_v10 = vmul.f32 %v144_v28, %v294_v24  ;;  %v159_v12 = vmul.f32 %v144_v28, %v311_v30  ;;  %v160_v13 = vmul.f32 %v144_v28, %v300_v26 }
 0x141   :  { %163 = vst [vmem:[%s401_s3 + $0x10] sm:$0xff] %v149_v27 }
 0x142   :  { %164 = vst [vmem:[%s401_s3 + $0x18] sm:$0xff] %v150_v29 }
 0x143   :  { %165 = vst [vmem:[%s401_s3 + $0x20] sm:$0xff] %v151_v31 }
 0x144   :  { %166 = vst [vmem:[%s401_s3 + $0x28] sm:$0xff] %v152_v32 }
 0x145   :  { %167 = vst [vmem:[%s401_s3 + $0x30] sm:$0x1] %v153_v4 }
 0x146   :  { %168 = vst [vmem:[%s401_s3 + $0x38] sm:$0xff] %v154_v5 }
 0x147   :  { %169 = vst [vmem:[%s401_s3 + $0x40] sm:$0xff] %v155_v7 }
 0x148   :  { %170 = vst [vmem:[%s401_s3 + $0x48] sm:$0xff] %v156_v9 }
 0x149   :  { %171 = vst [vmem:[%s401_s3 + $0x50] sm:$0xff] %v157_v15 }
 0x14a   :  { %172 = vst [vmem:[%s401_s3 + $0x58] sm:$0xff] %v158_v10 }
 0x14b   :  { %173 = vst [vmem:[%s401_s3 + $0x60] sm:$0xff] %v159_v12 }
 0x14c   :  { %174 = vst [vmem:[%s401_s3 + $0x68] sm:$0x1] %v160_v13 }

// kernel: tpu_custom_call.1
= control target key start
LH: loop header
LB: loop body
LE: loop exit
PB: predicated region body
PF: predicated region fallthrough
CT: control target
= control target key end

     0   :  { %vm33_vm0 = vcmask 1040384   ;;  %vm73_vm1 = vcmask 1041409   ;;  %vm98_vm2 = vcmask 64512   ;;  %s398_s1 = inlined_call_operand.vmem [shape: f32[128,8], index: 1, kind: input, shape index: {}]   ;;  %s399_s0 = inlined_call_operand.vmem [shape: f32[2,49,128], index: 0, kind: input, shape index: {}]   ;;  %s400_s2 = inlined_call_operand.vmem [shape: f32[8,128], index: 2, kind: input, shape index: {}]   ;;  %s401_s3 = inlined_call_operand.vmem [shape: f32[2,49,128], index: 3, kind: output, shape index: {}]  }
   0x1   :  { %v70_v0 = vld [vmem:[%s398_s1 + $0x78] sm:$0xff]  ;;  %v69_v1 = vld [vmem:[%s398_s1 + $0x70] sm:$0xff]  ;;  %v68_v2 = vld [vmem:[%s398_s1 + $0x68] sm:$0xff] }
   0x2   :  { %76 = vmatpush.msra.mxu0 %v70_v0  ;;  %v67_v3 = vld [vmem:[%s398_s1 + $0x60] sm:$0xff]  ;;  %v225_v5 = vld [vmem:[%s399_s0 + $0x8] sm:$0xff]  ;;  %v66_v6 = vld [vmem:[%s398_s1 + $0x58] sm:$0xff] }
   0x3   :  { %v220_v4 = vld [vmem:[%s399_s0] sm:$0xff]  ;;  %v233_v7 = vld [vmem:[%s399_s0 + $0x10] sm:$0xff]  ;;  %v240_v9 = vld [vmem:[%s399_s0 + $0x18] sm:$0xff] }
   0x4   :  { %77 = vmatpush.msra.mxu0 %v69_v1  ;;  %v28_v8 = vadd.f32 %v225_v5, %v220_v4  ;;  %v245_v10 = vld [vmem:[%s399_s0 + $0x38] sm:$0xff]  ;;  %v65_v11 = vld [vmem:[%s398_s1 + $0x50] sm:$0xff]  ;;  %v253_v12 = vld [vmem:[%s399_s0 + $0x40] sm:$0xff] }
   0x5   :  { %v258_v13 = vld [vmem:[%s399_s0 + $0x48] sm:$0xff]  ;;  %v264_v15 = vld [vmem:[%s399_s0 + $0x20] sm:$0xff]  ;;  %v42_v16 = vadd.f32 %v253_v12, %v245_v10  ;;  %v274_v18 = vld [vmem:[%s399_s0 + $0x30] sm:$0x1] }
   0x6   :  { %78 = vmatpush.msra.mxu0 %v68_v2  ;;  %v29_v14 = vadd.f32 %v28_v8, %v233_v7  ;;  %v64_v17 = vld [vmem:[%s398_s1 + $0x48] sm:$0xff]  ;;  %v279_v19 = vld [vmem:[%s399_s0 + $0x50] sm:$0xff]  ;;  %v63_v23 = vld [vmem:[%s398_s1 + $0x40] sm:$0xff]  ;;  %v34_v27 = vsel %vm33_vm0, %v274_v18, 0.0 }
   0x7   :  { %v285_v21 = vld [vmem:[%s399_s0 + $0x28] sm:$0xff]  ;;  %v43_v22 = vadd.f32 %v42_v16, %v258_v13  ;;  %v294_v24 = vld [vmem:[%s399_s0 + $0x58] sm:$0xff]  ;;  %v311_v30 = vld [vmem:[%s399_s0 + $0x60] sm:$0xff] }
   0x8   :  { %79 = vmatpush.msra.mxu0 %v67_v3  ;;  %v30_v20 = vadd.f32 %v29_v14, %v240_v9  ;;  %v300_v26 = vld [vmem:[%s399_s0 + $0x68] sm:$0x1]  ;;  %v62_v29 = vld [vmem:[%s398_s1 + $0x38] sm:$0xff]  ;;  %v61_v33 = vld [vmem:[%s398_s1 + $0x30] sm:$0xff] }
   0x9   :  { %v44_v28 = vadd.f32 %v43_v22, %v279_v19  ;;  %v47_v35 = vsel %vm33_vm0, %v300_v26, 0.0  ;;  %v60_v37 = vld [vmem:[%s398_s1 + $0x28] sm:$0xff]  ;;  %v59_v40 = vld [vmem:[%s398_s1 + $0x20] sm:$0xff]  ;;  %v58_v43 = vld [vmem:[%s398_s1 + $0x18] sm:$0xff] }
   0xa   :  { %80 = vmatpush.msra.mxu0 %v66_v6  ;;  %v31_v25 = vadd.f32 %v30_v20, %v264_v15  ;;  %v57_v46 = vld [vmem:[%s398_s1 + $0x10] sm:$0xff]  ;;  %v56_v49 = vld [vmem:[%s398_s1 + $0x8] sm:$0xff]  ;;  %v55_v52 = vld [vmem:[%s398_s1] sm:$0xff] }
   0xb   :  { %v45_v32 = vadd.f32 %v44_v28, %v294_v24  ;;  %v97_v57 = vld [vmem:[%s400_s2] sm:$0xff] }
   0xc   :  { %81 = vmatpush.msra.mxu0 %v65_v11  ;;  %v32_v31 = vadd.f32 %v31_v25, %v285_v21  ;;  %117 = vmatpush.msra.mxu1 %v97_v57 }
   0xd   :  { %v46_v36 = vadd.f32 %v45_v32, %v311_v30 }
   0xe   :  { %82 = vmatpush.msra.mxu0 %v64_v17  ;;  %v35_v34 = vadd.f32 %v34_v27, %v32_v31 }
   0xf   :  { %v48_v39 = vadd.f32 %v47_v35, %v46_v36 }
  0x10   :  { %83 = vmatpush.msra.mxu0 %v63_v23  ;;  %v36_v38 = vrot.slane %v35_v34, 4 }
  0x11   :  { %v49_v42 = vrot.slane %v48_v39, 4 }
  0x12   :  { %84 = vmatpush.msra.mxu0 %v62_v29  ;;  %v37_v41 = vadd.f32 %v36_v38, %v35_v34 }
  0x13   :  { %v50_v45 = vadd.f32 %v49_v42, %v48_v39 }
  0x14   :  { %85 = vmatpush.msra.mxu0 %v61_v33  ;;  %v38_v44 = vrot.slane %v37_v41, 2 }
  0x15   :  { %v51_v48 = vrot.slane %v50_v45, 2 }
  0x16   :  { %86 = vmatpush.msra.mxu0 %v60_v37  ;;  %v39_v47 = vadd.f32 %v38_v44, %v37_v41 }
  0x17   :  { %v52_v51 = vadd.f32 %v51_v48, %v50_v45 }
  0x18   :  { %87 = vmatpush.msra.mxu0 %v59_v40  ;;  %v40_v50 = vrot.slane %v39_v47, 1 }
  0x19   :  { %v53_v54 = vrot.slane %v52_v51, 1 }
  0x1a   :  { %88 = vmatpush.msra.mxu0 %v58_v43  ;;  %v41_v53 = vadd.f32 %v40_v50, %v39_v47 }
  0x1b   :  { %v54_v55 = vadd.f32 %v53_v54, %v52_v51 }
  0x1c   :  { %89 = vmatpush.msra.mxu0 %v57_v46 }
  0x1d   :  { %v74_v56 = vsel %vm73_vm1, %v54_v55, %v41_v53 }
  0x1e   :  { %90 = vmatpush.msra.mxu0 %v56_v49 }
  0x20   :  { %91 = vmatpush.msra.mxu0 %v55_v52 }
  0x21   :  { %92 = vmatmul.f32.vlgmr.msra.gmra.mxu0 %v74_v56 }
  0x9e   :  { %v93_v58 = vpop.f32.mrf.mxu0 }
  0x9f   :  { %v96_v59 = vmax.f32 %v93_v58, 0.0 }
  0xa1   :  { %179 = vmatmul.msk.f32.vlgmr.msra.gmra.mxu1 %vm98_vm2, %v96_v59 }
 0x11e   :  { %v119_v60 = vpop.f32.mrf.mxu1 }
 0x11f   :  { %v180_v61 = vmul.f32 -1.442695, %v119_v60 }
 0x121   :  { %181 = vpow2.f32 %v180_v61 }
 0x127   :  { %v182_v62 = vpop.eup %181 }
 0x128   :  { %v125_v63 = vadd.f32 1.0, %v182_v62 }
 0x12a   :  { %183 = vrcp.f32 %v125_v63  ;;  %v137_v3 = vand.u32 2147483648, %v125_v63  ;;  %v135_v8 = vand.u32 2147483647, %v125_v63  ;;  %vm131_vm4 = vweird.f32 %v125_v63 }
 0x12c   :  { %v138_v14 = vor.u32 1.1754944e-38, %v137_v3  ;;  %vm136_vm6 = vcmp.eq.f32.partialorder %v135_v8, 8.507059e+37 }
 0x130   :  { %v184_v0 = vpop.eup %183 }
 0x131   :  { %v127_v1 = vmul.f32 %v184_v0, %v125_v63  ;;  %vm132_vm3 = vweird.f32 %v184_v0 }
 0x132   :  { %vm133_vm5 = vmor %vm131_vm4, %vm132_vm3 }
 0x133   :  { %v128_v2 = vsub.f32 1.0, %v127_v1 }
 0x135   :  { %v129_v6 = vmul.f32 %v184_v0, %v128_v2 }
 0x137   :  { %v130_v11 = vadd.f32 %v184_v0, %v129_v6 }
 0x139   :  { %v134_v16 = vsel %vm133_vm5, %v184_v0, %v130_v11 }
 0x13a   :  { %v139_v17 = vsel %vm136_vm6, %v138_v14, %v134_v16 }
 0x13b   :  { %v142_v20 = vrot.slane %v139_v17, 1  ;;  %v143_v22 = vperm.slane %v139_v17, 0 }
 0x13d   :  { %v147_v23 = vmul.f32 %v143_v22, %v220_v4  ;;  %v148_v25 = vmul.f32 %v143_v22, %v225_v5  ;;  %v149_v27 = vmul.f32 %v143_v22, %v233_v7  ;;  %v144_v28 = vperm.slane %v142_v20, 0 }
 0x13e   :  { %v150_v29 = vmul.f32 %v143_v22, %v240_v9  ;;  %v151_v31 = vmul.f32 %v143_v22, %v264_v15  ;;  %v152_v32 = vmul.f32 %v143_v22, %v285_v21  ;;  %v153_v4 = vmul.f32 %v143_v22, %v274_v18 }
 0x13f   :  { %161 = vst [vmem:[%s401_s3] sm:$0xff] %v147_v23  ;;  %v154_v5 = vmul.f32 %v144_v28, %v245_v10  ;;  %v155_v7 = vmul.f32 %v144_v28, %v253_v12  ;;  %v156_v9 = vmul.f32 %v144_v28, %v258_v13  ;;  %v157_v15 = vmul.f32 %v144_v28, %v279_v19 }
 0x140   :  { %162 = vst [vmem:[%s401_s3 + $0x8] sm:$0xff] %v148_v25  ;;  %v158_v10 = vmul.f32 %v144_v28, %v294_v24  ;;  %v159_v12 = vmul.f32 %v144_v28, %v311_v30  ;;  %v160_v13 = vmul.f32 %v144_v28, %v300_v26 }
 0x141   :  { %163 = vst [vmem:[%s401_s3 + $0x10] sm:$0xff] %v149_v27 }
 0x142   :  { %164 = vst [vmem:[%s401_s3 + $0x18] sm:$0xff] %v150_v29 }
 0x143   :  { %165 = vst [vmem:[%s401_s3 + $0x20] sm:$0xff] %v151_v31 }
 0x144   :  { %166 = vst [vmem:[%s401_s3 + $0x28] sm:$0xff] %v152_v32 }
 0x145   :  { %167 = vst [vmem:[%s401_s3 + $0x30] sm:$0x1] %v153_v4 }
 0x146   :  { %168 = vst [vmem:[%s401_s3 + $0x38] sm:$0xff] %v154_v5 }
 0x147   :  { %169 = vst [vmem:[%s401_s3 + $0x40] sm:$0xff] %v155_v7 }
 0x148   :  { %170 = vst [vmem:[%s401_s3 + $0x48] sm:$0xff] %v156_v9 }
 0x149   :  { %171 = vst [vmem:[%s401_s3 + $0x50] sm:$0xff] %v157_v15 }
 0x14a   :  { %172 = vst [vmem:[%s401_s3 + $0x58] sm:$0xff] %v158_v10 }
 0x14b   :  { %173 = vst [vmem:[%s401_s3 + $0x60] sm:$0xff] %v159_v12 }
 0x14c   :  { %174 = vst [vmem:[%s401_s3 + $0x68] sm:$0x1] %v160_v13 }

</bundles_post_ra>
